<compile_context>
chip_gen: v7x
topology: tpu7x:2x2x1
jax: 0.10.0
libtpu: 0.0.40
codegen_flags: <defaults>
</compile_context>

<pallas_src>
import functools

import jax
import jax.numpy as jnp
from jax import lax
from jax.experimental import pallas as pl
from jax.experimental.pallas import tpu as pltpu

_NUM_CORE_SPLITS = 2  # v7x has 2 TensorCores; extra outer step is harmless on v5e/v6e.
_SUBLANE_ALIGN = {4: 8, 2: 16, 1: 32}


def _sublane_align(dtypes):
    return max(_SUBLANE_ALIGN.get(jnp.dtype(d).itemsize, 8) for d in dtypes)


def _vmem_budget_bytes():
    """Budget for the 3 double-buffered input streams (~VMEM/4, capped at 32 MiB)."""
    cap = 128 * 1024 * 1024
    try:
        info = pltpu.get_tpu_info()
        cap = int(getattr(info, "vmem_capacity_bytes", cap))
    except Exception:
        pass
    # v5e/v6e (128 MiB) -> 32 MiB ; v7x (64 MiB) -> 16 MiB.
    return max(8 * 1024 * 1024, min(32 * 1024 * 1024, cap // 4))


def _stream_bytes_per_row(N, dtypes):
    # 3 input streams, each double-buffered by the BlockSpec pipeline.
    return sum(2 * N * jnp.dtype(d).itemsize for d in dtypes)


def _choose_tile_rows(B, N, dtypes, budget_bytes):
    align = _sublane_align(dtypes)
    tb = budget_bytes // _stream_bytes_per_row(N, dtypes)
    # Prefer >= ~8 batch tiles (>= 4 per core on v7x) when B permits, so the DMA
    # pipeline has steps to overlap; never go below the sublane alignment.
    if B >= 8 * align:
        tb = min(tb, -(-B // 8))
    if tb >= B:
        return B  # full-dimension block: always layout-legal.
    return max(align, (tb // align) * align)


def _make_kernel(batch, tile_rows, tiles_per_core):
    def portfolio_mse_kernel(pw_ref, ar_ref, mask_ref, out_ref, acc_ref):
        c = pl.program_id(0)  # core split (parallel)
        i = pl.program_id(1)  # batch tile within this core (arbitrary)

        @pl.when(i == 0)
        def _init():
            acc_ref[...] = jnp.zeros_like(acc_ref)

        # Upcast to f32 AFTER the (native-dtype) load — keeps HBM bytes minimal.
        pw = pw_ref[...].astype(jnp.float32)   # (TB, N) predicted weights
        ar = ar_ref[...].astype(jnp.float32)   # (TB, N) actual returns
        m = mask_ref[...].astype(jnp.float32)  # (TB, N) mask

        mar = m * ar  # reuse masked returns for both lane reductions

        # portfolio_pred_return = sum(pred_weights * mask * actual_returns, dim=1)
        pred_ret = jnp.sum(pw * mar, axis=1, keepdims=True)       # (TB, 1)
        # actual_portfolio_return = sum(mask*actual_returns, dim=1) / (mask.sum(dim=1)+1e-8)
        masked_ret_sum = jnp.sum(mar, axis=1, keepdims=True)      # (TB, 1)
        mask_count = jnp.sum(m, axis=1, keepdims=True)            # (TB, 1)
        actual_ret = masked_ret_sum / (mask_count + 1e-8)         # (TB, 1)

        diff = pred_ret - actual_ret

        # Row-validity mask for the ragged last tile / phantom tiles (select, not
        # multiply, so garbage rows — even NaN/Inf — contribute exactly 0).
        row_start = (c * tiles_per_core + i) * tile_rows
        row_ids = lax.broadcasted_iota(jnp.int32, (tile_rows, 1), 0) + row_start
        dsq = jnp.where(row_ids < batch, diff * diff, 0.0)

        # Accumulate raw sum of squared diffs in a per-core VMEM scratch.
        acc_ref[...] += jnp.sum(dsq, keepdims=True)

        @pl.when(i == pl.num_programs(1) - 1)
        def _finalize():
            # Output block (one element per core) is written exactly once.
            out_ref[...] = acc_ref[...].reshape(out_ref.shape)

    return portfolio_mse_kernel


@functools.partial(jax.jit, static_argnames=("tile_rows",))
def portfolio_mse_loss(pred_weights, actual_returns, mask, tile_rows=None):
    if mask.dtype == jnp.bool_:
        mask = mask.astype(jnp.int8)  # same byte width; kernel upcasts to f32.

    B, N = pred_weights.shape
    dtypes = (pred_weights.dtype, actual_returns.dtype, mask.dtype)
    align = _sublane_align(dtypes)
    budget = _vmem_budget_bytes()

    if tile_rows is None:
        tb = _choose_tile_rows(B, N, dtypes, budget)
    else:
        tb = min(int(tile_rows), B)
        if tb < B:
            tb = max(align, (tb // align) * align)

    num_tiles = pl.cdiv(B, tb)
    tiles_per_core = -(-num_tiles // _NUM_CORE_SPLITS)
    last_tile = num_tiles - 1

    def in_index_map(c, i):
        # Clamp so phantom tiles (when 2*tiles_per_core > num_tiles) re-read the last
        # in-bounds block; their contribution is zeroed by the in-kernel row mask.
        return (jnp.minimum(c * tiles_per_core + i, last_tile), 0)

    needed_vmem = tb * _stream_bytes_per_row(N, dtypes)
    vmem_limit = max(needed_vmem + 4 * 1024 * 1024, 32 * 1024 * 1024)

    bytes_accessed = sum(B * N * jnp.dtype(d).itemsize for d in dtypes) + _NUM_CORE_SPLITS * 4

    out = pl.pallas_call(
        _make_kernel(B, tb, tiles_per_core),
        out_shape=jax.ShapeDtypeStruct((_NUM_CORE_SPLITS, 1, 1), jnp.float32),
        grid_spec=pltpu.PrefetchScalarGridSpec(
            num_scalar_prefetch=0,
            grid=(_NUM_CORE_SPLITS, tiles_per_core),
            in_specs=[
                pl.BlockSpec((tb, N), in_index_map),
                pl.BlockSpec((tb, N), in_index_map),
                pl.BlockSpec((tb, N), in_index_map),
            ],
            # One (1,1) output element per core; block index constant over the inner
            # (arbitrary) axis so it stays resident and is written exactly once.
            out_specs=pl.BlockSpec((1, 1, 1), lambda c, i: (c, 0, 0)),
            scratch_shapes=[pltpu.VMEM((1, 1), jnp.float32)],
        ),
        compiler_params=pltpu.CompilerParams(
            dimension_semantics=("parallel", "arbitrary"),
            vmem_limit_bytes=int(vmem_limit),
        ),
        cost_estimate=pl.CostEstimate(
            flops=6 * B * N,
            bytes_accessed=int(bytes_accessed),
            transcendentals=0,
        ),
    )(pred_weights, actual_returns, mask)

    # Per-core partial sums -> mean over the TRUE batch size.
    return jnp.sum(out) * (1.0 / B)


def reference_loss(pred_weights, actual_returns, mask):
    masked_weights = pred_weights * mask
    pred_ret = jnp.sum(masked_weights * actual_returns, axis=1)
    actual_ret = jnp.sum(mask * actual_returns, axis=1) / (jnp.sum(mask, axis=1) + 1e-8)
    return jnp.mean((pred_ret - actual_ret) ** 2)


if __name__ == "__main__":
    key = jax.random.PRNGKey(0)
    k1, k2, k3, k4, k5, k6 = jax.random.split(key, 6)

    # Case 1: small f32 batch — single full-batch tile, core 1 fully masked.
    B, N = 8, 128
    pred_weights = jax.nn.softmax(jax.random.normal(k1, (B, N), dtype=jnp.float32), axis=1)
    actual_returns = 0.01 * jax.random.normal(k2, (B, N), dtype=jnp.float32)
    mask = (jax.random.uniform(k3, (B, N)) > 0.3).astype(jnp.float32)

    loss = jax.block_until_ready(portfolio_mse_loss(pred_weights, actual_returns, mask))
    ref = jax.block_until_ready(reference_loss(pred_weights, actual_returns, mask))
    assert jnp.allclose(loss, ref, rtol=1e-5, atol=1e-8), (loss, ref)

    # Case 2: native bf16 values + f32 mask, ragged batch (B=40, tb=16 -> 3 tiles
    # split over 2 cores, one phantom clamped/masked tile, ragged last 8 rows).
    B2, N2 = 40, 128
    pw2 = jax.nn.softmax(jax.random.normal(k4, (B2, N2), dtype=jnp.float32), axis=1).astype(jnp.bfloat16)
    ar2 = (0.01 * jax.random.normal(k5, (B2, N2), dtype=jnp.float32)).astype(jnp.bfloat16)
    m2 = (jax.random.uniform(k6, (B2, N2)) > 0.3).astype(jnp.float32)

    loss2 = jax.block_until_ready(portfolio_mse_loss(pw2, ar2, m2, tile_rows=16))
    ref2 = jax.block_until_ready(
        reference_loss(pw2.astype(jnp.float32), ar2.astype(jnp.float32), m2))
    assert jnp.allclose(loss2, ref2, rtol=2e-5, atol=1e-8), (loss2, ref2)

    print("KERNEL_OK")
</pallas_src>

<mosaic_0001>
module attributes {stable_mosaic.version = 11 : i64} {
  func.func @portfolio_mse_kernel(%arg0: i32, %arg1: i32, %arg2: memref<8x128xf32, #tpu.memory_space<vmem>>, %arg3: memref<8x128xf32, #tpu.memory_space<vmem>>, %arg4: memref<8x128xf32, #tpu.memory_space<vmem>>, %arg5: memref<1x1x1xf32, #tpu.memory_space<vmem>>, %arg6: memref<1x1xf32, #tpu.memory_space<vmem>>) attributes {dimension_semantics = [#tpu.dimension_semantics<parallel>, #tpu.dimension_semantics<arbitrary>], iteration_bounds = array<i64: 2, 1>, scalar_prefetch = 0 : i64, scratch_operands = 1 : i64, tpu.core_type = #tpu.core_type<tc>, window_params = [{transform_indices = @transform_0, window_bounds = array<i64: 8, 128>}, {transform_indices = @transform_1, window_bounds = array<i64: 8, 128>}, {transform_indices = @transform_2, window_bounds = array<i64: 8, 128>}, {transform_indices = @transform_3, window_bounds = array<i64: 1, 1, 1>}]} {
    %c0_i32 = arith.constant 0 : i32
    %0 = arith.cmpi eq, %arg1, %c0_i32 : i32
    %1 = arith.extui %0 : i1 to i32
    %c0_i32_0 = arith.constant 0 : i32
    %2 = arith.cmpi ne, %1, %c0_i32_0 : i32
    scf.if %2 {
      %cst_18 = arith.constant 0.000000e+00 : f32
      %40 = vector.broadcast %cst_18 : f32 to vector<1x1xf32>
      %c0_19 = arith.constant 0 : index
      %c0_20 = arith.constant 0 : index
      %41 = vector.load %arg6[%c0_19, %c0_20] : memref<1x1xf32, #tpu.memory_space<vmem>>, vector<1x1xf32>
      tpu.vector_store %arg6[%c0_19, %c0_20], %40 {strides = array<i32>} : memref<1x1xf32, #tpu.memory_space<vmem>>, vector<1x1xf32>,
    } else {
    }
    %c0 = arith.constant 0 : index
    %c0_1 = arith.constant 0 : index
    %3 = vector.load %arg2[%c0, %c0_1] : memref<8x128xf32, #tpu.memory_space<vmem>>, vector<8x128xf32>
    %c0_2 = arith.constant 0 : index
    %c0_3 = arith.constant 0 : index
    %4 = vector.load %arg3[%c0_2, %c0_3] : memref<8x128xf32, #tpu.memory_space<vmem>>, vector<8x128xf32>
    %c0_4 = arith.constant 0 : index
    %c0_5 = arith.constant 0 : index
    %5 = vector.load %arg4[%c0_4, %c0_5] : memref<8x128xf32, #tpu.memory_space<vmem>>, vector<8x128xf32>
    %6 = arith.mulf %5, %4 : vector<8x128xf32>
    %7 = arith.mulf %3, %6 : vector<8x128xf32>
    %cst = arith.constant dense<0.000000e+00> : vector<8xf32>
    %8 = vector.multi_reduction <add>, %7, %cst [1] : vector<8x128xf32> to vector<8xf32>
    %9 = vector.shape_cast %8 : vector<8xf32> to vector<8x1xf32>
    %cst_6 = arith.constant dense<0.000000e+00> : vector<8xf32>
    %10 = vector.multi_reduction <add>, %6, %cst_6 [1] : vector<8x128xf32> to vector<8xf32>
    %11 = vector.shape_cast %10 : vector<8xf32> to vector<8x1xf32>
    %cst_7 = arith.constant dense<0.000000e+00> : vector<8xf32>
    %12 = vector.multi_reduction <add>, %5, %cst_7 [1] : vector<8x128xf32> to vector<8xf32>
    %13 = vector.shape_cast %12 : vector<8xf32> to vector<8x1xf32>
    %cst_8 = arith.constant 9.99999993E-9 : f32
    %14 = vector.broadcast %cst_8 : f32 to vector<8x1xf32>
    %15 = arith.addf %13, %14 : vector<8x1xf32>
    %16 = arith.divf %11, %15 : vector<8x1xf32>
    %17 = arith.subf %9, %16 : vector<8x1xf32>
    %c1_i32 = arith.constant 1 : i32
    %18 = arith.muli %arg0, %c1_i32 : i32
    %19 = arith.addi %18, %arg1 : i32
    %c8_i32 = arith.constant 8 : i32
    %20 = arith.muli %19, %c8_i32 : i32
    %21 = tpu.iota {dimensions = array<i32: 0>} : vector<8x1xi32>
    %22 = vector.broadcast %20 : i32 to vector<8x1xi32>
    %23 = arith.addi %21, %22 : vector<8x1xi32>
    %c8_i32_9 = arith.constant 8 : i32
    %24 = vector.broadcast %c8_i32_9 : i32 to vector<8x1xi32>
    %25 = arith.cmpi slt, %23, %24 : vector<8x1xi32>
    %26 = arith.mulf %17, %17 : vector<8x1xf32>
    %cst_10 = arith.constant 0.000000e+00 : f32
    %27 = vector.broadcast %cst_10 : f32 to vector<8x1xf32>
    %28 = arith.select %25, %26, %27 : vector<8x1xi1>, vector<8x1xf32>
    %c0_11 = arith.constant 0 : index
    %c0_12 = arith.constant 0 : index
    %29 = vector.load %arg6[%c0_11, %c0_12] : memref<1x1xf32, #tpu.memory_space<vmem>>, vector<1x1xf32>
    %30 = vector.shape_cast %28 : vector<8x1xf32> to vector<1x8x1xf32>
    %cst_13 = arith.constant dense<0.000000e+00> : vector<1xf32>
    %31 = vector.multi_reduction <add>, %30, %cst_13 [1, 2] : vector<1x8x1xf32> to vector<1xf32>
    %32 = vector.shape_cast %31 : vector<1xf32> to vector<1x1x1xf32>
    %33 = vector.extract %32[0, 0, 0] : f32 from vector<1x1x1xf32>
    %34 = vector.broadcast %33 : f32 to vector<1x1xf32>
    %35 = arith.addf %29, %34 : vector<1x1xf32>
    %c0_14 = arith.constant 0 : index
    %c0_15 = arith.constant 0 : index
    %36 = vector.load %arg6[%c0_14, %c0_15] : memref<1x1xf32, #tpu.memory_space<vmem>>, vector<1x1xf32>
    tpu.vector_store %arg6[%c0_14, %c0_15], %35 {strides = array<i32>} : memref<1x1xf32, #tpu.memory_space<vmem>>, vector<1x1xf32>,
    %c0_i32_16 = arith.constant 0 : i32
    %37 = arith.cmpi eq, %arg1, %c0_i32_16 : i32
    %38 = arith.extui %37 : i1 to i32
    %c0_i32_17 = arith.constant 0 : i32
    %39 = arith.cmpi ne, %38, %c0_i32_17 : i32
    scf.if %39 {
      %c0_18 = arith.constant 0 : index
      %c0_19 = arith.constant 0 : index
      %40 = vector.load %arg6[%c0_18, %c0_19] : memref<1x1xf32, #tpu.memory_space<vmem>>, vector<1x1xf32>
      %41 = vector.shape_cast %40 : vector<1x1xf32> to vector<1x1x1xf32>
      %c0_20 = arith.constant 0 : index
      %c0_21 = arith.constant 0 : index
      %c0_22 = arith.constant 0 : index
      %42 = vector.load %arg5[%c0_20, %c0_21, %c0_22] : memref<1x1x1xf32, #tpu.memory_space<vmem>>, vector<1x1x1xf32>
      tpu.vector_store %arg5[%c0_20, %c0_21, %c0_22], %41 {strides = array<i32>} : memref<1x1x1xf32, #tpu.memory_space<vmem>>, vector<1x1x1xf32>,
    } else {
    }
    return
  }
  func.func @transform_0(%arg0: i32, %arg1: i32) -> (i32, i32) {
    %c1_i32 = arith.constant 1 : i32
    %0 = arith.muli %arg0, %c1_i32 : i32
    %1 = arith.addi %0, %arg1 : i32
    %c0_i32 = arith.constant 0 : i32
    %2 = arith.minsi %1, %c0_i32 : i32
    %c0_i32_0 = arith.constant 0 : i32
    %c0_i32_1 = arith.constant 0 : i32
    return %2, %c0_i32_0 : i32, i32
  }
  func.func @transform_1(%arg0: i32, %arg1: i32) -> (i32, i32) {
    %c1_i32 = arith.constant 1 : i32
    %0 = arith.muli %arg0, %c1_i32 : i32
    %1 = arith.addi %0, %arg1 : i32
    %c0_i32 = arith.constant 0 : i32
    %2 = arith.minsi %1, %c0_i32 : i32
    %c0_i32_0 = arith.constant 0 : i32
    %c0_i32_1 = arith.constant 0 : i32
    return %2, %c0_i32_0 : i32, i32
  }
  func.func @transform_2(%arg0: i32, %arg1: i32) -> (i32, i32) {
    %c1_i32 = arith.constant 1 : i32
    %0 = arith.muli %arg0, %c1_i32 : i32
    %1 = arith.addi %0, %arg1 : i32
    %c0_i32 = arith.constant 0 : i32
    %2 = arith.minsi %1, %c0_i32 : i32
    %c0_i32_0 = arith.constant 0 : i32
    %c0_i32_1 = arith.constant 0 : i32
    return %2, %c0_i32_0 : i32, i32
  }
  func.func @transform_3(%arg0: i32, %arg1: i32) -> (i32, i32, i32) {
    %c0_i32 = arith.constant 0 : i32
    %c0_i32_0 = arith.constant 0 : i32
    %c0_i32_1 = arith.constant 0 : i32
    return %arg0, %c0_i32, %c0_i32_0 : i32, i32, i32
  }
}

</mosaic_0001>

<bundles_post_ra>
// kernel: portfolio_mse_loss.1
= control target key start
LH: loop header
LB: loop body
LE: loop exit
PB: predicated region body
PF: predicated region fallthrough
CT: control target
= control target key end

     0   :  { %8 = vsyncpa [#allocation4], 0  ;;  %s868_s0 = inlined_call_operand.hbm [shape: f32[8,128], index: 0, kind: input, shape index: {}]   ;;  %s869_s1 = inlined_call_operand.hbm [shape: f32[8,128], index: 1, kind: input, shape index: {}]   ;;  %s870_s2 = inlined_call_operand.hbm [shape: f32[8,128], index: 2, kind: input, shape index: {}]   ;;  %s871_s3 = inlined_call_operand.vmem [shape: f32[2,1,1], index: 3, kind: output, shape index: {}]  }
   0x1   :  { %10 = vsyncpa [#allocation4 + $0x1], 0 }
   0x2   :  { %11 = vsyncpa [#allocation6], 0 }
   0x3   :  { %13 = vsyncpa [#allocation6 + $0x1], 0  ;;  %s718_s12 = smov 0   ;;  %s720_s13 = smov 0  }
   0x4   :  { %s722_s14 = smov 0   ;;  %s724_s15 = smov 0  }
   0x5   :  { %s726_s16 = smov 0  }
   0x6 LB: > { %s464_s17 = sadd.s32 4294967295, %s692_s16   ;;  %s31_s18 = sadd.s32 1, %s688_s15  ;;  %s692_s16 = sphi %s726_s16, %s19_s16   ;;  %s688_s15 = sphi %s724_s15, %s887_s15   ;;  %s684_s14 = sphi %s722_s14, %s886_s14   ;;  %s680_s13 = sphi %s720_s13, %s858_s13   ;;  %s676_s12 = sphi %s718_s12, %s885_s12  }
   0x7   : > { %p33_p0 = scmp.ge.s32.totalorder %s31_s18, 2  ;;  %p673_p1 = scmp.ne.s32.totalorder %s680_s13, 0 }
   0x8   : > { %p52_p2 = scmp.eq.s32.totalorder %s692_s16, 0  ;;  %p57_p3 = scmp.ne.s32.totalorder %s680_s13, %s676_s12 }
   0x9   : > { %s889_s18 = smov (%p33_p0, %s31_s18), 0  ;;  %p58_p4 = scmp.eq.s32.totalorder %s464_s17, 0 }
   0xa   : > { %p53_p5 = por %p673_p1, %p52_p2  ;;  %p499_p7 = scmp.lt.s32.totalorder %s692_s16, 2 }
   0xb   : > { %p750_p6 = por %p58_p4, %p57_p3  ;;  %s192_s21 = sand.u32 1, %s692_s16  }
   0xc   : > { %p755_p8 = pnand %p499_p7, %p53_p5  ;;  %s694_s22 = smov [#allocation5]  }
   0xd   : > { %s875_s19 = scalar_select %p750_p6, 1, 0 }
   0xe   : > { %s876_s20 = scalar_select %p755_p8, 1, 0 }
   0xf   : > { %s206_s23 = sshll.u32 %s694_s22, 4  ;;  %s761_s24 = scalar_lea.sflag [#allocation6], %s192_s21  ;;  %s207_s23 = int_to_ptr.vmem [resolvable:$true] %s206_s23 }
  0x10   : > { %s551_s27 = scalar_lea.hbm %s869_s1, 128  ;;  %p771_p11 = pneg %p755_p8 }
  0x11   : > { %p552_p10 = scmp.ne.s32.totalorder %s869_s1, %s551_s27  ;;  %p558_p0 = scmp.lt.u32.totalorder %s551_s27, %s551_s27 }
  0x12   : > { %p560_p1 = scmp.lt.u32.totalorder %s551_s27, %s869_s1 }
  0x13   : > { %p554_p12 = pnand %p771_p11, %p552_p10 }
  0x14   : > { %p561_p2 = por %p560_p1, %p558_p0 }
  0x15   : > { %p555_p13 = pneg %p554_p12 }
  0x17   : > { %p562_p3 = pnand %p561_p2, %p555_p13 }
  0x19   : > { %565 = shalt.err (!%p562_p3)
}
  0x1a   : > { %s566_s6 = scalar_lea.vmem %s207_s23, 128  ;;  %s573_s7 = scalar_lea.vmem %s207_s23, 256 }
  0x1b   : > { %p567_p4 = scmp.ne.s32.totalorder %s207_s23, %s566_s6  ;;  %p574_p9 = scmp.lt.s32.totalorder %s207_s23, %s207_s23 }
  0x1c   : > { %p575_p6 = scmp.lt.s32.totalorder %s573_s7, %s566_s6 }
  0x1d   : > { %p569_p5 = pnand %p567_p4, %p771_p11 }
  0x1e   : > { %p576_p8 = por %p575_p6, %p574_p9 }
  0x1f   : > { %p570_p7 = pneg %p569_p5 }
  0x21   : > { %p577_p10 = pnand %p576_p8, %p570_p7 }
  0x23   : > { %580 = shalt.err (!%p577_p10)
}
  0x24   : > { %p878_p12 = scmp.ne.s32.totalorder %s876_s20, 0  ;;  %p232_p13 = scmp.lt.s32.totalorder %s692_s16, 3 }
  0x25   : > { %p879_p0 = scmp.ge.s32.totalorder %s692_s16, 1  ;;  %s695_s11 = smov [#allocation3]  }
  0x26   : > { %495 = dma.hbm_to_vmem [thread:$0]  (!%p878_p12), %s869_s1, 128, %s207_s23, %s761_s24  }
  0x27   : > { %p791_p1 = pnand %p879_p0, %p232_p13  ;;  %s185_s12 = sshll.u32 %s695_s11, 4  ;;  %s186_s12 = int_to_ptr.vmem [resolvable:$true] %s185_s12 }
  0x28   : > { %s581_s25 = scalar_lea.hbm %s868_s0, 128 }
  0x29   : > { %s880_s10 = scalar_select %p791_p1, 1, 0 }
  0x2a   : > { %p582_p6 = scmp.ne.s32.totalorder %s868_s0, %s581_s25  ;;  %p588_p2 = scmp.lt.u32.totalorder %s581_s25, %s581_s25 }
  0x2b   : > { %p590_p3 = scmp.lt.u32.totalorder %s581_s25, %s868_s0 }
  0x2c   : > { %p584_p8 = pnand %p582_p6, %p771_p11 }
  0x2d   : > { %p591_p4 = por %p590_p3, %p588_p2 }
  0x2e   : > { %p585_p9 = pneg %p584_p8 }
  0x30   : > { %p592_p5 = pnand %p591_p4, %p585_p9 }
  0x32   : > { %595 = shalt.err (!%p592_p5)
}
  0x33   : > { %s596_s29 = scalar_lea.vmem %s186_s12, 128  ;;  %s603_s4 = scalar_lea.vmem %s186_s12, 256 }
  0x34   : > { %p597_p7 = scmp.ne.s32.totalorder %s186_s12, %s596_s29  ;;  %p604_p0 = scmp.lt.s32.totalorder %s186_s12, %s186_s12 }
  0x35   : > { %p605_p1 = scmp.lt.s32.totalorder %s603_s4, %s596_s29 }
  0x36   : > { %p599_p10 = pnand %p597_p7, %p771_p11 }
  0x37   : > { %p606_p12 = por %p605_p1, %p604_p0 }
  0x38   : > { %p600_p13 = pneg %p599_p10 }
  0x3a   : > { %p607_p6 = pnand %p606_p12, %p600_p13 }
  0x3c   : > { %610 = shalt.err (!%p607_p6)
}
  0x3d   : > { %p881_p8 = scmp.ne.s32.totalorder %s876_s20, 0  ;;  %s696_s7 = smov [#allocation7]  }
  0x3e   : > { %s227_s8 = sshll.u32 %s696_s7, 4  ;;  %s611_s21 = scalar_lea.hbm %s870_s2, 128  ;;  %s228_s8 = int_to_ptr.vmem [resolvable:$true] %s227_s8 }
  0x3f   : > { %492 = dma.hbm_to_vmem [thread:$0]  (!%p881_p8), %s868_s0, 128, %s186_s12, [#allocation4]  }
  0x40   : > { %p612_p1 = scmp.ne.s32.totalorder %s870_s2, %s611_s21  ;;  %p618_p2 = scmp.lt.u32.totalorder %s611_s21, %s611_s21 }
  0x41   : > { %p620_p3 = scmp.lt.u32.totalorder %s611_s21, %s870_s2 }
  0x42   : > { %p614_p12 = pnand %p612_p1, %p771_p11 }
  0x43   : > { %p621_p4 = por %p620_p3, %p618_p2 }
  0x44   : > { %p615_p9 = pneg %p614_p12 }
  0x46   : > { %p622_p5 = pnand %p621_p4, %p615_p9 }
  0x48   : > { %625 = shalt.err (!%p622_p5)
}
  0x49   : > { %s626_s12 = scalar_lea.vmem %s228_s8, 128  ;;  %s633_s23 = scalar_lea.vmem %s228_s8, 256 }
  0x4a   : > { %p627_p7 = scmp.ne.s32.totalorder %s228_s8, %s626_s12  ;;  %p634_p0 = scmp.lt.s32.totalorder %s228_s8, %s228_s8 }
  0x4b   : > { %p635_p6 = scmp.lt.s32.totalorder %s633_s23, %s626_s12 }
  0x4c   : > { %p629_p10 = pnand %p627_p7, %p771_p11 }
  0x4d   : > { %p636_p8 = por %p635_p6, %p634_p0 }
  0x4e   : > { %p630_p13 = pneg %p629_p10 }
  0x50   : > { %p637_p1 = pnand %p636_p8, %p630_p13 }
  0x52   : > { %640 = shalt.err (!%p637_p1)
}
  0x53   : > { %p882_p12 = scmp.ne.s32.totalorder %s876_s20, 0  ;;  %p883_p9 = scmp.ne.s32.totalorder %s880_s10, 0 }
  0x54   : > { %s238_s30 = sand.u32 (!%p883_p9), 1, %s680_s13   ;;  %p884_p11 = scmp.ne.s32.totalorder (!%p883_p9), %s875_s19, 0 }
  0x55   : > { %498 = dma.hbm_to_vmem [thread:$0]  (!%p882_p12), %s870_s2, 128, %s228_s8, %s761_s24  }
  0x56   : > { %236 = sbr.rel (%p883_p9) target bundleno = 478 (0x1de), region = 32  ;;  %s475_s4 = sshll.u32 (!%p883_p9), %s238_s30, 3 }
  0x57   : > { %s239_s5 = scalar_lea.sflag (!%p883_p9), [#allocation4], %s238_s30  ;;  %s242_s6 = scalar_lea.vmem (!%p883_p9), [#allocation3], %s475_s4 }
  0x5d   : > { %666 = dma.done.wait (%p884_p11), %s239_s5, 128  }
  0x5e   : > { %668 = vsyncadd (%p884_p11), %s239_s5, 4294967168  ;;  %s247_s20 = sand.u32 1, %s464_s17   ;;  %s251_s24 = scalar_lea.vmem [#allocation5], %s475_s4 }
  0x5f   : > { %s248_s7 = scalar_lea.sflag [#allocation6], %s247_s20 }
  0x60   : > { %670 = dma.done.wait (%p884_p11), %s248_s7, 256  }
  0x61   : > { %672 = vsyncadd (%p884_p11), %s248_s7, 4294967040  ;;  %s260_s10 = scalar_lea.vmem [#allocation7], %s475_s4  ;;  %v310_v1 = vld [vmem:[%s251_s24] sm:$0xff]  ;;  %v309_v2 = vld [vmem:[%s242_s6] sm:$0xff]  ;;  %v326_v7 = vlaneseq  ;;  %s478_s17 = sshll.u32 %s684_s14, 3  ;;  %vm334_vm1 = vcmask 7168  }
  0x62   : > { %v311_v0 = vld [vmem:[%s260_s10] sm:$0xff]  ;;  %v328_v9 = vstv %s478_s17  ;;  %vm307_vm2 = vcmask 0   ;;  %v697_v19 = vmov 0.0   ;;  %p300_p8 = scmp.lt.s32.totalorder %s684_s14, 1 }
  0x63   : > { %318 = vadd.xlane.f32.xlu0 %v311_v0  ;;  %v312_v3 = vmul.f32 %v311_v0, %v310_v1  ;;  %v327_v8 = vshrl.u32 %v326_v7, 7  ;;  %308 = vst.msk [vmem:[#allocation2] sm:$0x1] %vm307_vm2, %v697_v19 }
  0x64   : > { %s891_s14 = smov (!%p300_p8, %s684_s14), 1 }
  0x65   : > { %v313_v4 = vmul.f32 %v312_v3, %v309_v2  ;;  %v329_v13 = vadd.s32 %v328_v9, %v327_v8  ;;  %s302_s11 = scalar_lea.vmem %s871_s3, %s891_s14 }
  0x67   : > { %316 = vadd.xlane.f32.xlu0 %v312_v3  ;;  %314 = vadd.xlane.f32.xlu1 %v313_v4  ;;  %vm330_vm0 = vcmp.lt.s32.totalorder %v329_v13, 8 }
  0x6a   : > { %v333_v27 = vld [vmem:[#allocation2] sm:$0x1] }
  0xf0   : > { %v319_v5 = vpop.xlane.xlu0 %318 }
  0xf1   : > { %v320_v6 = vadd.f32 1e-08, %v319_v5 }
  0xf3   : > { %549 = vrcp.f32 %v320_v6 }
  0xf4   : > { %v317_v10 = vpop.xlane.xlu0 %316  ;;  %v315_v12 = vpop.xlane.xlu1 %314 }
  0xfd   : > { %v550_v11 = vpop.eup %549 }
  0xfe   : > { %v322_v14 = vmul.f32 %v550_v11, %v317_v10 }
 0x100   : > { %v323_v15 = vsub.f32 %v315_v12, %v322_v14 }
 0x102   : > { %v331_v16 = vmul.f32 %v323_v15, %v323_v15 }
 0x104   : > { %v332_v17 = vsel %vm330_vm0, %v331_v16, 0.0 }
 0x105   : > { %v335_v18 = vsel %vm334_vm1, %v332_v17, 0.0 }
 0x106   : > { %336 = vadd.xlane.f32.xlu1 %v335_v18 }
 0x193   : > { %v337_v20 = vpop.xlane.xlu1 %336 }
 0x194   : > { %v338_v21 = vrot.slane %v337_v20, 4 }
 0x196   : > { %v339_v22 = vadd.f32 %v338_v21, %v337_v20 }
 0x198   : > { %v340_v23 = vrot.slane %v339_v22, 2 }
 0x19a   : > { %v341_v24 = vadd.f32 %v340_v23, %v339_v22 }
 0x19c   : > { %v342_v25 = vrot.slane %v341_v24, 1 }
 0x19e   : > { %v343_v26 = vadd.f32 %v342_v25, %v341_v24 }
 0x1a0   : > { %481 = vpush %v343_v26 }
 0x1d1   : > { %s482_s19 = spop %481 }
 0x1d2   : > { %v345_v28 = vstv %s482_s19 }
 0x1d3   : > { %v346_v29 = vadd.f32 %v345_v28, %v333_v27 }
 0x1d5   : > { %348 = vst.msk [vmem:[#allocation2] sm:$0x1] %vm307_vm2, %v346_v29 }
 0x1dc   : > { %v352_v30 = vld [vmem:[#allocation2] sm:$0x1] }
 0x1dd   : > { %353 = vst.msk [vmem:[%s302_s11] sm:$0x1] %vm307_vm2, %v352_v30 }
 0x1de PF: > { %s19_s16 = sadd.s32 1, %s692_s16   ;;  %s885_s12 = smov %s680_s13 }
 0x1df   : > { %p16_p2 = scmp.ge.s32.totalorder %s19_s16, 4   ;;  %s858_s13 = smov 0  }
 0x1e0   : > { %s886_s14 = smov %s688_s15  ;;  %s887_s15 = smov %s889_s18 }
 0x1e1   :  { %18 = sbr.rel (!%p16_p2) target bundleno = 6 (0x6), region = 104 }
 0x1e8   :  { %371 = vsyncpa [#allocation4], 1 }
 0x1e9   :  { %373 = vsyncpa [#allocation4 + $0x1], 1 }
 0x1ea   :  { %374 = vsyncpa [#allocation6], 1 }
 0x1eb   :  { %376 = vsyncpa [#allocation6 + $0x1], 1 }

</bundles_post_ra>
